<compile_context>
chip_gen: v7x
topology: tpu7x:2x2x1
jax: 0.10.0
libtpu: 0.0.40
codegen_flags: <defaults>
</compile_context>

<pallas_src>
import functools
import types

import jax
import jax.numpy as jnp
from jax.experimental import pallas as pl
from jax.experimental.pallas import tpu as pltpu


# -----------------------------------------------------------------------------
# helpers
# -----------------------------------------------------------------------------
def _round_up(x, m):
    return ((x + m - 1) // m) * m


def _elu(y):
    """ELU(alpha=1) with expm1-grade precision on the negative branch.

    expm1(t) = 2*tanh(t/2) / (1 - tanh(t/2)) for t = min(y, 0): matches torch's
    expm1-based ELU near 0, never generates transient inf on the discarded
    positive branch, and relies only on ops guaranteed to lower in Mosaic.
    """
    t = jnp.tanh(0.5 * jnp.minimum(y, 0.0))
    return jnp.where(y > 0.0, y, 2.0 * t / (1.0 - t))


# -----------------------------------------------------------------------------
# Fused MLP kernel (all layers in one pallas_call, activation resident in VMEM)
# -----------------------------------------------------------------------------
def _fused_mlp_kernel(x_ref, *refs, layer_flags):
    """Process one [block_n, d_pad] row tile through the whole MLP.

    refs = (w_0, b_0, ..., w_{L-1}, b_{L-1}, o_ref, h_ref)
      w_l   : bf16 [d_pad, d_pad]  (zero-padded, pre-transposed: y = x @ w)
      b_l   : f32  [1, d_pad]      (zero-padded)
      o_ref : f32  [block_n, d_pad]
      h_ref : f32  VMEM scratch [block_n, d_pad]  -- activation never leaves VMEM
    """
    n_layers = len(layer_flags)
    o_ref = refs[2 * n_layers]
    h_ref = refs[2 * n_layers + 1]

    h_ref[...] = x_ref[...].astype(jnp.float32)
    for l, (apply_skip, apply_act) in enumerate(layer_flags):   # static unroll
        w = refs[2 * l][...]                      # bf16, MXU-native
        b = refs[2 * l + 1][...]                  # f32, pre-padded (no re-cast)
        h = h_ref[...]                            # f32
        y = jnp.dot(h.astype(jnp.bfloat16), w,    # bf16 MXU, f32 accumulate
                    preferred_element_type=jnp.float32)
        y = y + b
        if apply_skip:                            # residual when d_in == d_out
            y = y + h
        if apply_act:                             # ELU (all but last layer)
            y = _elu(y)
        h_ref[...] = y
    o_ref[...] = h_ref[...]


def fused_mlp_forward(x, padded_params, layer_flags, d_out, d_pad, block_n=256):
    """x: [N, d_in] -> [N, d_out]; exactly one pallas_call for the whole MLP."""
    N, d_in = x.shape
    n_pad8 = _round_up(max(N, 8), 8)
    block_n = min(block_n, n_pad8)           # 8 is only the divisibility floor
    n_pad = _round_up(N, block_n)

    xp = jnp.zeros((n_pad, d_pad), jnp.bfloat16).at[:N, :d_in].set(
        x.astype(jnp.bfloat16))

    in_specs = [pl.BlockSpec((block_n, d_pad), lambda i: (i, 0))]
    flat_params = []
    for w_p, b_p in padded_params:
        flat_params += [w_p, b_p]
        in_specs += [pl.BlockSpec((d_pad, d_pad), lambda i: (0, 0)),
                     pl.BlockSpec((1, d_pad), lambda i: (0, 0))]

    kernel = functools.partial(_fused_mlp_kernel, layer_flags=layer_flags)
    out = pl.pallas_call(
        kernel,
        out_shape=jax.ShapeDtypeStruct((n_pad, d_pad), jnp.float32),
        grid_spec=pltpu.PrefetchScalarGridSpec(
            num_scalar_prefetch=0,
            grid=(n_pad // block_n,),
            in_specs=in_specs,
            out_specs=pl.BlockSpec((block_n, d_pad), lambda i: (i, 0)),
            scratch_shapes=[pltpu.VMEM((block_n, d_pad), jnp.float32)],
        ),
        compiler_params=pltpu.CompilerParams(
            dimension_semantics=("parallel",)),   # shards across TCs on v7x
    )(xp, *flat_params)
    return out[:N, :d_out]


class FusedMLP:
    """Mirrors MLP(dims, dropout=None, use_norm=False, use_skip=True, act='ELU')."""
    # TODO(synk): BatchNorm / Dropout branches of the reference MLP are not
    # exercised by the default config and are omitted.

    def __init__(self, dims, key, use_skip=True):
        self.dims = tuple(dims)
        self.use_skip = use_skip
        self.params = []
        for d1, d2 in zip(dims, dims[1:]):
            key, k_w, k_b = jax.random.split(key, 3)
            bound = 1.0 / (d1 ** 0.5)             # PyTorch nn.Linear init range
            w = jax.random.uniform(k_w, (d2, d1), jnp.float32, -bound, bound)
            b = jax.random.uniform(k_b, (d2,), jnp.float32, -bound, bound)
            self.params.append((w.T, b))          # store transposed: y = x @ W^T

        n = len(self.params)
        self.layer_flags = tuple(
            (use_skip and d1 == d2, i != n - 1)
            for i, (d1, d2) in enumerate(zip(dims, dims[1:])))

        # Pre-pad once to lane-dense d_pad; weights bf16 (MXU), biases f32.
        self.d_pad = _round_up(max(dims), 128)
        self.padded = []
        for w_t, b in self.params:
            d1, d2 = w_t.shape
            w_p = jnp.zeros((self.d_pad, self.d_pad), jnp.bfloat16)
            w_p = w_p.at[:d1, :d2].set(w_t.astype(jnp.bfloat16))
            b_p = jnp.zeros((1, self.d_pad), jnp.float32).at[0, :d2].set(b)
            self.padded.append((w_p, b_p))

    def __call__(self, x, block_n=256):
        return fused_mlp_forward(x, self.padded, self.layer_flags,
                                 d_out=self.dims[-1], d_pad=self.d_pad,
                                 block_n=block_n)

    def reference(self, x):
        """Pure-JAX reference mirroring the kernel numerics (bf16 MXU, f32 epilogue)."""
        h = x.astype(jnp.bfloat16).astype(jnp.float32)
        for (w_t, b), (skip, act) in zip(self.params, self.layer_flags):
            y = jnp.dot(h.astype(jnp.bfloat16), w_t.astype(jnp.bfloat16),
                        preferred_element_type=jnp.float32) + b
            if skip:
                y = y + h
            if act:
                y = _elu(y)
            h = y
        return h


# -----------------------------------------------------------------------------
# Per-graph mean pooling kernel (one-hot MXU reduction over node/edge tiles)
# -----------------------------------------------------------------------------
def _mean_pool_kernel(seg_ref, x_ref, inv_ref, o_ref, acc_ref):
    i = pl.program_id(0)

    @pl.when(i == 0)
    def _():
        acc_ref[...] = jnp.zeros_like(acc_ref)

    seg = seg_ref[...]                                   # [1, block_n] int32
    g_pad, block_n = acc_ref.shape[0], seg.shape[1]
    gids = jax.lax.broadcasted_iota(jnp.int32, (g_pad, block_n), 0)
    onehot_t = (seg == gids).astype(jnp.float32)         # [g_pad, block_n]
    acc_ref[...] += jnp.dot(onehot_t, x_ref[...],
                            preferred_element_type=jnp.float32)

    @pl.when(i == pl.num_programs(0) - 1)
    def _():
        o_ref[...] = acc_ref[...] * inv_ref[...]         # [g_pad,1] broadcasts


def segment_mean_pool(x, seg_ids, num_graphs, block_n=256):
    """Mean of x rows per graph id. x: [N, D], seg_ids: [N] int -> [num_graphs, D]."""
    N, D = x.shape
    d_pad = _round_up(D, 128)
    g_pad = _round_up(max(num_graphs, 8), 8)
    n_pad8 = _round_up(max(N, 8), 8)
    block_n = min(block_n, n_pad8)
    n_pad = _round_up(N, block_n)

    xp = jnp.zeros((n_pad, d_pad), jnp.float32).at[:N, :D].set(
        x.astype(jnp.float32))
    # Padded rows get segment id -1 -> match no graph -> contribute nothing.
    seg_row = jnp.full((1, n_pad), -1, jnp.int32).at[0, :N].set(
        seg_ids.astype(jnp.int32))

    counts = jnp.zeros((num_graphs,), jnp.float32).at[seg_ids].add(1.0)
    inv = jnp.where(counts > 0, 1.0 / jnp.maximum(counts, 1.0), 0.0)
    inv_p = jnp.zeros((g_pad, 1), jnp.float32).at[:num_graphs, 0].set(inv)

    out = pl.pallas_call(
        _mean_pool_kernel,
        out_shape=jax.ShapeDtypeStruct((g_pad, d_pad), jnp.float32),
        grid_spec=pltpu.PrefetchScalarGridSpec(
            num_scalar_prefetch=0,
            grid=(n_pad // block_n,),
            in_specs=[pl.BlockSpec((1, block_n), lambda i: (0, i)),
                      pl.BlockSpec((block_n, d_pad), lambda i: (i, 0)),
                      pl.BlockSpec((g_pad, 1), lambda i: (0, 0))],
            out_specs=pl.BlockSpec((g_pad, d_pad), lambda i: (0, 0)),
            scratch_shapes=[pltpu.VMEM((g_pad, d_pad), jnp.float32)],
        ),
        compiler_params=pltpu.CompilerParams(
            dimension_semantics=("arbitrary",)),   # reduction over row tiles
    )(seg_row, xp, inv_p)
    return out[:num_graphs, :D]


def _pool_reference(emb, seg, num_graphs):
    sums = jnp.zeros((num_graphs, emb.shape[1]), jnp.float32).at[seg].add(emb)
    cnts = jnp.zeros((num_graphs, 1), jnp.float32).at[seg].add(1.0)
    return sums / jnp.maximum(cnts, 1.0)


# -----------------------------------------------------------------------------
# Concrete encoder / pooler and the GraphEncoder composition
# -----------------------------------------------------------------------------
class MLPGraphFeatureEncoder:
    """Encodes node and edge features with fused-MLP Pallas kernels."""
    # TODO(synk): the reference `encoder` is an injected nn.Module (its message
    # passing over edge_index is not specified); we instantiate an MLP feature
    # encoder over node/edge features and carry edge_index unused.

    def __init__(self, node_dims, edge_dims, key):
        k_n, k_e = jax.random.split(key)
        self.node_mlp = FusedMLP(node_dims, k_n, use_skip=True)
        self.edge_mlp = FusedMLP(edge_dims, k_e, use_skip=True)

    def __call__(self, feats_node, feats_edge, edge_index, *,
                 graph_node_index, graph_edge_index):
        del edge_index, graph_node_index, graph_edge_index
        return self.node_mlp(feats_node), self.edge_mlp(feats_edge)


class MeanGraphPooler:
    """Per-graph mean pooling of node and edge embeddings, concatenated."""
    # TODO(synk): the reference `pooler` is an injected nn.Module; mean pooling
    # is used as a concrete instantiation.

    def __init__(self, num_graphs):
        self.num_graphs = num_graphs

    def __call__(self, emb_nodes, emb_edges, graph):
        pooled_n = segment_mean_pool(emb_nodes, graph.graph_node_index,
                                     self.num_graphs)
        pooled_e = segment_mean_pool(emb_edges, graph.graph_edge_index,
                                     self.num_graphs)
        return jnp.concatenate([pooled_n, pooled_e], axis=-1)


class GraphEncoderPallas:
    """Mirrors GraphEncoder(encoder, pooler).forward(graph)."""

    def __init__(self, encoder, pooler):
        self.encoder = encoder
        self.pooler = pooler

    def __call__(self, graph):
        emb_nodes, emb_edges = self.encoder(
            graph.feats_node, graph.feats_edge, graph.edge_index,
            graph_node_index=graph.graph_node_index,
            graph_edge_index=graph.graph_edge_index)
        return self.pooler(emb_nodes, emb_edges, graph)


def graph_encoder_reference(model, graph):
    """Pure-JAX forward reproducing the composed semantics (kernel-numerics mirror)."""
    emb_n = model.encoder.node_mlp.reference(graph.feats_node)
    emb_e = model.encoder.edge_mlp.reference(graph.feats_edge)
    pooled_n = _pool_reference(emb_n, graph.graph_node_index, model.pooler.num_graphs)
    pooled_e = _pool_reference(emb_e, graph.graph_edge_index, model.pooler.num_graphs)
    return jnp.concatenate([pooled_n, pooled_e], axis=-1)


# -----------------------------------------------------------------------------
# demo / self-check
# -----------------------------------------------------------------------------
if __name__ == "__main__":
    key = jax.random.PRNGKey(0)
    k_nodes, k_edges, k_ei, k_params = jax.random.split(key, 4)

    num_graphs = 2
    nodes_per_graph = (96, 160)      # 256 nodes total
    edges_per_graph = (120, 180)     # 300 edges total
    num_nodes = sum(nodes_per_graph)
    num_edges = sum(edges_per_graph)
    d_node, d_edge, hidden = 32, 16, 64

    feats_node = jax.random.normal(k_nodes, (num_nodes, d_node), jnp.float32)
    feats_edge = jax.random.normal(k_edges, (num_edges, d_edge), jnp.float32)
    edge_index = jax.random.randint(k_ei, (2, num_edges), 0, num_nodes,
                                    dtype=jnp.int32)
    graph_node_index = jnp.concatenate(
        [jnp.full((n,), g, jnp.int32) for g, n in enumerate(nodes_per_graph)])
    graph_edge_index = jnp.concatenate(
        [jnp.full((e,), g, jnp.int32) for g, e in enumerate(edges_per_graph)])

    graph = types.SimpleNamespace(
        feats_node=feats_node, feats_edge=feats_edge, edge_index=edge_index,
        graph_node_index=graph_node_index, graph_edge_index=graph_edge_index)

    encoder = MLPGraphFeatureEncoder(
        node_dims=(d_node, hidden, hidden),   # 2nd layer 64->64 -> skip path
        edge_dims=(d_edge, hidden, hidden),
        key=k_params)
    pooler = MeanGraphPooler(num_graphs=num_graphs)
    model = GraphEncoderPallas(encoder, pooler)

    out = jax.block_until_ready(model(graph))
    ref = jax.block_until_ready(graph_encoder_reference(model, graph))

    assert out.shape == (num_graphs, 2 * hidden), out.shape
    max_err = jnp.max(jnp.abs(out - ref))
    assert jnp.allclose(out, ref, atol=1e-3, rtol=1e-3), f"mismatch: {max_err}"

    print("KERNEL_OK")
</pallas_src>

<mosaic_0001>
module attributes {stable_mosaic.version = 11 : i64} {
  func.func @_fused_mlp_kernel(%arg0: i32, %arg1: memref<256x128xbf16, #tpu.memory_space<vmem>>, %arg2: memref<128x128xbf16, #tpu.memory_space<vmem>>, %arg3: memref<1x128xf32, #tpu.memory_space<vmem>>, %arg4: memref<128x128xbf16, #tpu.memory_space<vmem>>, %arg5: memref<1x128xf32, #tpu.memory_space<vmem>>, %arg6: memref<256x128xf32, #tpu.memory_space<vmem>>, %arg7: memref<256x128xf32, #tpu.memory_space<vmem>>) attributes {dimension_semantics = [#tpu.dimension_semantics<parallel>], iteration_bounds = array<i64: 1>, scalar_prefetch = 0 : i64, scratch_operands = 1 : i64, tpu.core_type = #tpu.core_type<tc>, window_params = [{transform_indices = @transform_0, window_bounds = array<i64: 256, 128>}, {pipeline_mode = #tpu.pipeline_mode<synchronous>, transform_indices = @transform_1, window_bounds = array<i64: 128, 128>}, {pipeline_mode = #tpu.pipeline_mode<synchronous>, transform_indices = @transform_2, window_bounds = array<i64: 1, 128>}, {pipeline_mode = #tpu.pipeline_mode<synchronous>, transform_indices = @transform_3, window_bounds = array<i64: 128, 128>}, {pipeline_mode = #tpu.pipeline_mode<synchronous>, transform_indices = @transform_4, window_bounds = array<i64: 1, 128>}, {transform_indices = @transform_5, window_bounds = array<i64: 256, 128>}]} {
    %c0 = arith.constant 0 : index
    %c0_0 = arith.constant 0 : index
    %0 = vector.load %arg1[%c0, %c0_0] : memref<256x128xbf16, #tpu.memory_space<vmem>>, vector<256x128xbf16>
    %1 = arith.extf %0 : vector<256x128xbf16> to vector<256x128xf32>
    %c0_1 = arith.constant 0 : index
    %c0_2 = arith.constant 0 : index
    %2 = vector.load %arg7[%c0_1, %c0_2] : memref<256x128xf32, #tpu.memory_space<vmem>>, vector<256x128xf32>
    tpu.vector_store %arg7[%c0_1, %c0_2], %1 {strides = array<i32>} : memref<256x128xf32, #tpu.memory_space<vmem>>, vector<256x128xf32>,
    %c0_3 = arith.constant 0 : index
    %c0_4 = arith.constant 0 : index
    %3 = vector.load %arg2[%c0_3, %c0_4] : memref<128x128xbf16, #tpu.memory_space<vmem>>, vector<128x128xbf16>
    %c0_5 = arith.constant 0 : index
    %c0_6 = arith.constant 0 : index
    %4 = vector.load %arg3[%c0_5, %c0_6] : memref<1x128xf32, #tpu.memory_space<vmem>>, vector<1x128xf32>
    %c0_7 = arith.constant 0 : index
    %c0_8 = arith.constant 0 : index
    %5 = vector.load %arg7[%c0_7, %c0_8] : memref<256x128xf32, #tpu.memory_space<vmem>>, vector<256x128xf32>
    %6 = arith.truncf %5 : vector<256x128xf32> to vector<256x128xbf16>
    %cst = arith.constant dense<0.000000e+00> : vector<256x128xf32>
    %7 = tpu.matmul %6, %3, %cst {dimension_numbers = #tpu.dot_dimension_numbers<[1], [0], [0], [1], [0, 0, 1, 1], [], []>} : vector<256x128xbf16>, vector<128x128xbf16>, vector<256x128xf32> -> vector<256x128xf32>
    %8 = vector.broadcast %4 : vector<1x128xf32> to vector<256x128xf32>
    %9 = arith.addf %7, %8 : vector<256x128xf32>
    %cst_9 = arith.constant 0.000000e+00 : f32
    %10 = vector.broadcast %cst_9 : f32 to vector<256x128xf32>
    %11 = arith.minimumf %9, %10 : vector<256x128xf32>
    %cst_10 = arith.constant 5.000000e-01 : f32
    %12 = vector.broadcast %cst_10 : f32 to vector<256x128xf32>
    %13 = arith.mulf %12, %11 : vector<256x128xf32>
    %14 = math.tanh %13 : vector<256x128xf32>
    %cst_11 = arith.constant 0.000000e+00 : f32
    %15 = vector.broadcast %cst_11 : f32 to vector<256x128xf32>
    %16 = arith.cmpf ogt, %9, %15 : vector<256x128xf32>
    %cst_12 = arith.constant 2.000000e+00 : f32
    %17 = vector.broadcast %cst_12 : f32 to vector<256x128xf32>
    %18 = arith.mulf %17, %14 : vector<256x128xf32>
    %cst_13 = arith.constant 1.000000e+00 : f32
    %19 = vector.broadcast %cst_13 : f32 to vector<256x128xf32>
    %20 = arith.subf %19, %14 : vector<256x128xf32>
    %21 = arith.divf %18, %20 : vector<256x128xf32>
    %22 = arith.select %16, %9, %21 : vector<256x128xi1>, vector<256x128xf32>
    %c0_14 = arith.constant 0 : index
    %c0_15 = arith.constant 0 : index
    %23 = vector.load %arg7[%c0_14, %c0_15] : memref<256x128xf32, #tpu.memory_space<vmem>>, vector<256x128xf32>
    tpu.vector_store %arg7[%c0_14, %c0_15], %22 {strides = array<i32>} : memref<256x128xf32, #tpu.memory_space<vmem>>, vector<256x128xf32>,
    %c0_16 = arith.constant 0 : index
    %c0_17 = arith.constant 0 : index
    %24 = vector.load %arg4[%c0_16, %c0_17] : memref<128x128xbf16, #tpu.memory_space<vmem>>, vector<128x128xbf16>
    %c0_18 = arith.constant 0 : index
    %c0_19 = arith.constant 0 : index
    %25 = vector.load %arg5[%c0_18, %c0_19] : memref<1x128xf32, #tpu.memory_space<vmem>>, vector<1x128xf32>
    %c0_20 = arith.constant 0 : index
    %c0_21 = arith.constant 0 : index
    %26 = vector.load %arg7[%c0_20, %c0_21] : memref<256x128xf32, #tpu.memory_space<vmem>>, vector<256x128xf32>
    %27 = arith.truncf %26 : vector<256x128xf32> to vector<256x128xbf16>
    %cst_22 = arith.constant dense<0.000000e+00> : vector<256x128xf32>
    %28 = tpu.matmul %27, %24, %cst_22 {dimension_numbers = #tpu.dot_dimension_numbers<[1], [0], [0], [1], [0, 0, 1, 1], [], []>} : vector<256x128xbf16>, vector<128x128xbf16>, vector<256x128xf32> -> vector<256x128xf32>
    %29 = vector.broadcast %25 : vector<1x128xf32> to vector<256x128xf32>
    %30 = arith.addf %28, %29 : vector<256x128xf32>
    %31 = arith.addf %30, %26 : vector<256x128xf32>
    %c0_23 = arith.constant 0 : index
    %c0_24 = arith.constant 0 : index
    %32 = vector.load %arg7[%c0_23, %c0_24] : memref<256x128xf32, #tpu.memory_space<vmem>>, vector<256x128xf32>
    tpu.vector_store %arg7[%c0_23, %c0_24], %31 {strides = array<i32>} : memref<256x128xf32, #tpu.memory_space<vmem>>, vector<256x128xf32>,
    %c0_25 = arith.constant 0 : index
    %c0_26 = arith.constant 0 : index
    %33 = vector.load %arg7[%c0_25, %c0_26] : memref<256x128xf32, #tpu.memory_space<vmem>>, vector<256x128xf32>
    %c0_27 = arith.constant 0 : index
    %c0_28 = arith.constant 0 : index
    %34 = vector.load %arg6[%c0_27, %c0_28] : memref<256x128xf32, #tpu.memory_space<vmem>>, vector<256x128xf32>
    tpu.vector_store %arg6[%c0_27, %c0_28], %33 {strides = array<i32>} : memref<256x128xf32, #tpu.memory_space<vmem>>, vector<256x128xf32>,
    return
  }
  func.func @transform_0(%arg0: i32) -> (i32, i32) {
    %c0_i32 = arith.constant 0 : i32
    %c0_i32_0 = arith.constant 0 : i32
    return %arg0, %c0_i32 : i32, i32
  }
  func.func @transform_1(%arg0: i32) -> (i32, i32) {
    %c0_i32 = arith.constant 0 : i32
    %c0_i32_0 = arith.constant 0 : i32
    %c0_i32_1 = arith.constant 0 : i32
    return %c0_i32, %c0_i32_0 : i32, i32
  }
  func.func @transform_2(%arg0: i32) -> (i32, i32) {
    %c0_i32 = arith.constant 0 : i32
    %c0_i32_0 = arith.constant 0 : i32
    %c0_i32_1 = arith.constant 0 : i32
    return %c0_i32, %c0_i32_0 : i32, i32
  }
  func.func @transform_3(%arg0: i32) -> (i32, i32) {
    %c0_i32 = arith.constant 0 : i32
    %c0_i32_0 = arith.constant 0 : i32
    %c0_i32_1 = arith.constant 0 : i32
    return %c0_i32, %c0_i32_0 : i32, i32
  }
  func.func @transform_4(%arg0: i32) -> (i32, i32) {
    %c0_i32 = arith.constant 0 : i32
    %c0_i32_0 = arith.constant 0 : i32
    %c0_i32_1 = arith.constant 0 : i32
    return %c0_i32, %c0_i32_0 : i32, i32
  }
  func.func @transform_5(%arg0: i32) -> (i32, i32) {
    %c0_i32 = arith.constant 0 : i32
    %c0_i32_0 = arith.constant 0 : i32
    return %arg0, %c0_i32 : i32, i32
  }
}

</mosaic_0001>

<bundles_post_ra>
// kernel: tpu_custom_call.1
= control target key start
LH: loop header
LB: loop body
LE: loop exit
PB: predicated region body
PF: predicated region fallthrough
CT: control target
= control target key end

     0   :  { %10 = vsyncpa [#allocation4], 0  ;;  %s2302_s0 = inlined_call_operand.hbm [shape: bf16[256,128], index: 0, kind: input, shape index: {}]   ;;  %s2303_s1 = inlined_call_operand.hbm [shape: bf16[128,128], index: 1, kind: input, shape index: {}]   ;;  %s2304_s2 = inlined_call_operand.vmem [shape: f32[1,128], index: 2, kind: input, shape index: {}]   ;;  %s2305_s3 = inlined_call_operand.hbm [shape: bf16[128,128], index: 3, kind: input, shape index: {}]   ;;  %s2306_s4 = inlined_call_operand.vmem [shape: f32[1,128], index: 4, kind: input, shape index: {}]   ;;  %s2307_s5 = inlined_call_operand.hbm [shape: f32[256,128], index: 5, kind: output, shape index: {}]  }
   0x1   :  { %11 = vsyncpa [#allocation7], 0 }
   0x2   :  { %12 = vsyncpa [#allocation5], 0  ;;  %s1672_s18 = smov [#allocation6]   ;;  %s1673_s20 = smov [#allocation3]  }
   0x3   :  { %s30_s19 = sshll.u32 %s1672_s18, 4  ;;  %s18_s21 = sshll.u32 %s1673_s20, 4  ;;  %s31_s19 = int_to_ptr.vmem [resolvable:$true] %s30_s19  ;;  %s1710_s21 = int_to_ptr.vmem [resolvable:$true] %s18_s21 }
   0x4   :  { %s1578_s24 = scalar_lea.hbm %s2303_s1, 1024 }
   0x5   :  { %p1579_p0 = scmp.ne.s32.totalorder %s2303_s1, %s1578_s24  ;;  %p1582_p1 = scmp.lt.u32.totalorder %s1578_s24, %s2303_s1 }
   0x7   :  { %p1584_p2 = pnand %p1582_p1, %p1579_p0 }
   0x9   :  { %1587 = shalt.err (!%p1584_p2)
}
   0xa   :  { %s1588_s29 = scalar_lea.vmem %s31_s19, 1024  ;;  %p1593_p4 = scmp.lt.s32.totalorder %s31_s19, %s31_s19 }
   0xb   :  { %p1589_p3 = scmp.ne.s32.totalorder %s31_s19, %s1588_s29  ;;  %p1594_p5 = scmp.lt.s32.totalorder %s1588_s29, %s1588_s29 }
   0xd   :  { %p1595_p6 = por %p1594_p5, %p1593_p4 }
   0xf   :  { %p1596_p7 = pnand %p1595_p6, %p1589_p3 }
  0x11   :  { %1599 = shalt.err (!%p1596_p7)
}
  0x12   :  { %s1674_s30 = smov 64   ;;  %s1675_s6 = smov 4  }
  0x13   :  { %36 = dma.hbm_to_vmem [thread:$0]  %s2303_s1, 1024, %s31_s19, [#allocation7], %s1674_s30, %s1674_s30, %s1675_s6  }
  0x14   :  { %s1600_s11 = scalar_lea.hbm %s2302_s0, 2048 }
  0x15   :  { %p1601_p8 = scmp.ne.s32.totalorder %s2302_s0, %s1600_s11  ;;  %p1604_p9 = scmp.lt.u32.totalorder %s1600_s11, %s2302_s0 }
  0x17   :  { %p1606_p10 = pnand %p1604_p9, %p1601_p8 }
  0x19   :  { %1609 = shalt.err (!%p1606_p10)
}
  0x1a   :  { %s1610_s16 = scalar_lea.vmem %s1710_s21, 2048  ;;  %p1615_p12 = scmp.lt.s32.totalorder %s1710_s21, %s1710_s21 }
  0x1b   :  { %p1611_p11 = scmp.ne.s32.totalorder %s1710_s21, %s1610_s16  ;;  %p1616_p13 = scmp.lt.s32.totalorder %s1610_s16, %s1610_s16 }
  0x1d   :  { %p1617_p0 = por %p1616_p13, %p1615_p12 }
  0x1f   :  { %p1618_p1 = pnand %p1617_p0, %p1611_p11 }
  0x21   :  { %1621 = shalt.err (!%p1618_p1)
}
  0x22   :  { %24 = dma.hbm_to_vmem [thread:$0]  %s2302_s0, 2048, %s1710_s21, [#allocation4], %s1674_s30, %s1674_s30, %s1675_s6  }
  0x23   :  { %s1676_s18 = smov [#allocation8]   ;;  %s1622_s23 = scalar_lea.hbm %s2305_s3, 1024 }
  0x24   :  { %s44_s19 = sshll.u32 %s1676_s18, 4  ;;  %p1623_p2 = scmp.ne.s32.totalorder %s2305_s3, %s1622_s23  ;;  %s45_s19 = int_to_ptr.vmem [resolvable:$true] %s44_s19 }
  0x25   :  { %p1626_p3 = scmp.lt.u32.totalorder %s1622_s23, %s2305_s3 }
  0x27   :  { %p1628_p4 = pnand %p1626_p3, %p1623_p2 }
  0x29   :  { %1631 = shalt.err (!%p1628_p4)
}
  0x2a   :  { %s1632_s28 = scalar_lea.vmem %s45_s19, 1024  ;;  %p1637_p6 = scmp.lt.s32.totalorder %s45_s19, %s45_s19 }
  0x2b   :  { %p1633_p5 = scmp.ne.s32.totalorder %s45_s19, %s1632_s28  ;;  %p1638_p7 = scmp.lt.s32.totalorder %s1632_s28, %s1632_s28 }
  0x2d   :  { %p1639_p8 = por %p1638_p7, %p1637_p6 }
  0x2f   :  { %p1640_p9 = pnand %p1639_p8, %p1633_p5 }
  0x31   :  { %1643 = shalt.err (!%p1640_p9)
}
  0x32   :  { %50 = dma.hbm_to_vmem [thread:$0]  %s2305_s3, 1024, %s45_s19, [#allocation7], %s1674_s30, %s1674_s30, %s1675_s6  }
  0x33   :  { %1666 = dma.done.wait [#allocation4], 2048  }
  0x34   :  { %1667 = vsyncadd [#allocation4], 4294965248 }
  0x35   :  { %1668 = dma.done.wait [#allocation7], 2048  }
  0x36   :  { %1669 = vsyncadd [#allocation7], 4294965248  ;;  %v1434_v0 = vld [vmem:[#allocation6] sm:$0xff]   ;;  %v1435_v1 = vld [vmem:[#allocation6 + $0x8] sm:$0xff]  }
  0x37   :  { %1330 = vmatprep.subr.bf16.mxu0 %v1434_v0  ;;  %v1436_v2 = vld [vmem:[#allocation6 + $0x10] sm:$0xff]   ;;  %v1437_v3 = vld [vmem:[#allocation6 + $0x18] sm:$0xff]   ;;  %v1204_v4 = vld [vmem:[#allocation3] sm:$0xff]  }
  0x38   :  { %1331 = vmatpush3.bf16.msra.mxu0 %v1434_v0  ;;  %1346 = vmatprep.mubr.bf16.mxu0 %v1204_v4  ;;  %v1438_v5 = vld [vmem:[#allocation6 + $0x20] sm:$0xff]   ;;  %v1439_v6 = vld [vmem:[#allocation6 + $0x28] sm:$0xff]   ;;  %v1440_v7 = vld [vmem:[#allocation6 + $0x30] sm:$0xff]  }
  0x39   :  { %1332 = vmatprep.subr.bf16.mxu0 %v1435_v1  ;;  %v1441_v8 = vld [vmem:[#allocation6 + $0x38] sm:$0xff]   ;;  %v1267_v9 = vld [vmem:[#allocation3 + $0x8] sm:$0xff]   ;;  %v1268_v10 = vld [vmem:[#allocation3 + $0x10] sm:$0xff]  }
  0x3a   :  { %v1269_v11 = vld [vmem:[#allocation3 + $0x18] sm:$0xff]   ;;  %v1270_v12 = vld [vmem:[#allocation3 + $0x20] sm:$0xff]   ;;  %v1271_v13 = vld [vmem:[#allocation3 + $0x28] sm:$0xff]  }
  0x3b   :  { %v1272_v14 = vld [vmem:[#allocation3 + $0x30] sm:$0xff]   ;;  %v1273_v15 = vld [vmem:[#allocation3 + $0x38] sm:$0xff]   ;;  %v1274_v16 = vld [vmem:[#allocation3 + $0x40] sm:$0xff]  }
  0x3c   :  { %1333 = vmatpush3.bf16.msra.mxu0 %v1435_v1  ;;  %v1275_v17 = vld [vmem:[#allocation3 + $0x48] sm:$0xff]   ;;  %v1276_v18 = vld [vmem:[#allocation3 + $0x50] sm:$0xff]   ;;  %v1277_v19 = vld [vmem:[#allocation3 + $0x58] sm:$0xff]  }
  0x3d   :  { %1334 = vmatprep.subr.bf16.mxu0 %v1436_v2  ;;  %v1278_v20 = vld [vmem:[#allocation3 + $0x60] sm:$0xff]   ;;  %v1279_v21 = vld [vmem:[#allocation3 + $0x68] sm:$0xff]   ;;  %v1280_v22 = vld [vmem:[#allocation3 + $0x70] sm:$0xff]  }
  0x3e   :  { %v1281_v23 = vld [vmem:[#allocation3 + $0x78] sm:$0xff]   ;;  %v1442_v24 = vld [vmem:[#allocation8] sm:$0xff]   ;;  %v1443_v25 = vld [vmem:[#allocation8 + $0x8] sm:$0xff]  }
  0x3f   :  { %1378 = vmatprep.subr.bf16.mxu1 %v1442_v24  ;;  %v1444_v26 = vld [vmem:[#allocation8 + $0x10] sm:$0xff]   ;;  %v1445_v27 = vld [vmem:[#allocation8 + $0x18] sm:$0xff]   ;;  %v1446_v28 = vld [vmem:[#allocation8 + $0x20] sm:$0xff]  }
  0x40   :  { %1335 = vmatpush3.bf16.msra.mxu0 %v1436_v2  ;;  %1379 = vmatpush3.bf16.msra.mxu1 %v1442_v24  ;;  %v1447_v29 = vld [vmem:[#allocation8 + $0x28] sm:$0xff]   ;;  %v1448_v30 = vld [vmem:[#allocation8 + $0x30] sm:$0xff]   ;;  %v1449_v31 = vld [vmem:[#allocation8 + $0x38] sm:$0xff]  }
  0x41   :  { %1336 = vmatprep.subr.bf16.mxu0 %v1437_v3  ;;  %1380 = vmatprep.subr.bf16.mxu1 %v1443_v25  ;;  %v1765_v32 = vld [vmem:[%s2304_s2] ss:$0 sm:$0xff] }
  0x44   :  { %1337 = vmatpush3.bf16.msra.mxu0 %v1437_v3  ;;  %1381 = vmatpush3.bf16.msra.mxu1 %v1443_v25 }
  0x45   :  { %1338 = vmatprep.subr.bf16.mxu0 %v1438_v5  ;;  %1382 = vmatprep.subr.bf16.mxu1 %v1444_v26 }
  0x48   :  { %1339 = vmatpush3.bf16.msra.mxu0 %v1438_v5  ;;  %1383 = vmatpush3.bf16.msra.mxu1 %v1444_v26 }
  0x49   :  { %1340 = vmatprep.subr.bf16.mxu0 %v1439_v6  ;;  %1384 = vmatprep.subr.bf16.mxu1 %v1445_v27 }
  0x4c   :  { %1341 = vmatpush3.bf16.msra.mxu0 %v1439_v6  ;;  %1385 = vmatpush3.bf16.msra.mxu1 %v1445_v27 }
  0x4d   :  { %1342 = vmatprep.subr.bf16.mxu0 %v1440_v7  ;;  %1386 = vmatprep.subr.bf16.mxu1 %v1446_v28 }
  0x50   :  { %1343 = vmatpush3.bf16.msra.mxu0 %v1440_v7  ;;  %1387 = vmatpush3.bf16.msra.mxu1 %v1446_v28 }
  0x51   :  { %1344 = vmatprep.subr.bf16.mxu0 %v1441_v8  ;;  %1388 = vmatprep.subr.bf16.mxu1 %v1447_v29 }
  0x54   :  { %1345 = vmatpush3.bf16.msra.mxu0 %v1441_v8  ;;  %1389 = vmatpush3.bf16.msra.mxu1 %v1447_v29 }
  0x55   :  { %1390 = vmatprep.subr.bf16.mxu1 %v1448_v30 }
  0x57   :  { %1347 = vmatmul.mubr.bf16.vlgmr.msra.gmra.mrb[0].mxu0 %v1267_v9 }
  0x58   :  { %1350 = vmatprep.mubr.bf16.mxu0 %v1268_v10  ;;  %1391 = vmatpush3.bf16.msra.mxu1 %v1448_v30 }
  0x59   :  { %1392 = vmatprep.subr.bf16.mxu1 %v1449_v31 }
  0x5c   :  { %1393 = vmatpush3.bf16.msra.mxu1 %v1449_v31 }
  0x5f   :  { %1351 = vmatmul.mubr.bf16.gmra.mrb[4].mxu0 %v1269_v11 }
  0x60   :  { %1354 = vmatprep.mubr.bf16.mxu0 %v1270_v12 }
  0x67   :  { %1355 = vmatmul.mubr.bf16.gmra.mrb[8].mxu0 %v1271_v13 }
  0x68   :  { %1358 = vmatprep.mubr.bf16.mxu0 %v1272_v14 }
  0x6f   :  { %1359 = vmatmul.mubr.bf16.gmra.mrb[12].mxu0 %v1273_v15 }
  0x70   :  { %1362 = vmatprep.mubr.bf16.mxu0 %v1274_v16 }
  0x77   :  { %1363 = vmatmul.mubr.bf16.gmra.mrb[16].mxu0 %v1275_v17 }
  0x78   :  { %1366 = vmatprep.mubr.bf16.mxu0 %v1276_v18 }
  0x7f   :  { %1367 = vmatmul.mubr.bf16.gmra.mrb[20].mxu0 %v1277_v19 }
  0x80   :  { %1370 = vmatprep.mubr.bf16.mxu0 %v1278_v20 }
  0x87   :  { %1371 = vmatmul.mubr.bf16.gmra.mrb[24].mxu0 %v1279_v21 }
  0x88   :  { %1374 = vmatprep.mubr.bf16.mxu0 %v1280_v22 }
  0x8f   :  { %1375 = vmatmul.mubr.bf16.gmra.mrb[28].mxu0 %v1281_v23 }
 0x12a   :  { %v1348_v33 = vpop.f32.mrb[0].mxu0 }
 0x12b   :  { %v1768_v34 = vadd.f32 %v1348_v33, %v1765_v32  ;;  %v312_v35 = vpop.f32.mrb[1].mxu0 }
 0x12c   :  { %v1771_v36 = vadd.f32 %v1765_v32, %v312_v35  ;;  %v1349_v37 = vpop.f32.mrb[2].mxu0 }
 0x12d   :  { %v441_v38 = vmin.f32 %v1768_v34, 0.0  ;;  %v1775_v39 = vadd.f32 %v1349_v37, %v1765_v32  ;;  %v315_v40 = vpop.f32.mrb[3].mxu0  ;;  %vm537_vm0 = vcmp.gt.f32.partialorder %v1768_v34, 0.0 }
 0x12e   :  { %v439_v41 = vmin.f32 %v1771_v36, 0.0  ;;  %v1779_v42 = vadd.f32 %v1765_v32, %v315_v40  ;;  %vm535_vm1 = vcmp.gt.f32.partialorder %v1771_v36, 0.0 }
 0x12f   :  { %v473_v43 = vmul.f32 0.5, %v441_v38  ;;  %v442_v44 = vmin.f32 %v1775_v39, 0.0  ;;  %vm538_vm2 = vcmp.gt.f32.partialorder %v1775_v39, 0.0 }
 0x130   :  { %v471_v45 = vmul.f32 0.5, %v439_v41  ;;  %v440_v46 = vmin.f32 %v1779_v42, 0.0  ;;  %vm536_vm3 = vcmp.gt.f32.partialorder %v1779_v42, 0.0 }
 0x131   :  { %1450 = vtanh.f32 %v473_v43  ;;  %v474_v47 = vmul.f32 0.5, %v442_v44 }
 0x132   :  { %1452 = vtanh.f32 %v471_v45  ;;  %v1352_v48 = vpop.f32.mrb[4].mxu0  ;;  %v472_v51 = vmul.f32 0.5, %v440_v46 }
 0x133   :  { %1454 = vtanh.f32 %v474_v47  ;;  %v1784_v49 = vadd.f32 %v1352_v48, %v1765_v32  ;;  %v328_v50 = vpop.f32.mrb[5].mxu0 }
 0x134   :  { %v1787_v52 = vadd.f32 %v1765_v32, %v328_v50  ;;  %v1353_v53 = vpop.f32.mrb[6].mxu0  ;;  %1456 = vtanh.f32 %v472_v51 }
 0x135   :  { %v445_v54 = vmin.f32 %v1784_v49, 0.0  ;;  %v1791_v55 = vadd.f32 %v1353_v53, %v1765_v32  ;;  %v331_v56 = vpop.f32.mrb[7].mxu0  ;;  %vm541_vm6 = vcmp.gt.f32.partialorder %v1784_v49, 0.0 }
 0x136   :  { %v443_v57 = vmin.f32 %v1787_v52, 0.0  ;;  %v1795_v58 = vadd.f32 %v1765_v32, %v331_v56  ;;  %vm539_vm4 = vcmp.gt.f32.partialorder %v1787_v52, 0.0 }
 0x137   :  { %v477_v59 = vmul.f32 0.5, %v445_v54  ;;  %v446_v60 = vmin.f32 %v1791_v55, 0.0  ;;  %vm542_vm7 = vcmp.gt.f32.partialorder %v1791_v55, 0.0 }
 0x138   :  { %v475_v61 = vmul.f32 0.5, %v443_v57  ;;  %v444_v62 = vmin.f32 %v1795_v58, 0.0  ;;  %vm540_vm5 = vcmp.gt.f32.partialorder %v1795_v58, 0.0 }
 0x139   :  { %1458 = vtanh.f32 %v477_v59  ;;  %v478_v63 = vmul.f32 0.5, %v446_v60 }
 0x13a   :  { %1460 = vtanh.f32 %v475_v61  ;;  %v476_v0 = vmul.f32 0.5, %v444_v62  ;;  %v1356_v1 = vpop.f32.mrb[8].mxu0 }
 0x13b   :  { %v1799_v2 = vpop.eup %1450  ;;  %1462 = vtanh.f32 %v478_v63  ;;  %v1802_v3 = vadd.f32 %v1356_v1, %v1765_v32  ;;  %v344_v4 = vpop.f32.mrb[9].mxu0 }
 0x13c   :  { %v1804_v5 = vpop.eup %1452  ;;  %v601_v6 = vsub.f32 1.0, %v1799_v2  ;;  %1464 = vtanh.f32 %v476_v0  ;;  %v1808_v7 = vadd.f32 %v1765_v32, %v344_v4  ;;  %v1357_v8 = vpop.f32.mrb[10].mxu0 }
 0x13d   :  { %v1810_v9 = vpop.eup %1454  ;;  %v449_v10 = vmin.f32 %v1802_v3, 0.0  ;;  %v1814_v11 = vadd.f32 %v1357_v8, %v1765_v32  ;;  %v347_v12 = vpop.f32.mrb[11].mxu0  ;;  %v599_v19 = vsub.f32 1.0, %v1804_v5  ;;  %vm545_vm9 = vcmp.gt.f32.partialorder %v1802_v3, 0.0 }
 0x13e   :  { %v602_v13 = vsub.f32 1.0, %v1810_v9  ;;  %v447_v14 = vmin.f32 %v1808_v7, 0.0  ;;  %1466 = vrcp.f32 %v601_v6  ;;  %v1820_v17 = vadd.f32 %v1765_v32, %v347_v12  ;;  %v1824_v22 = vpop.eup %1456 }
 0x13f   :  { %v481_v15 = vmul.f32 0.5, %v449_v10  ;;  %v450_v16 = vmin.f32 %v1814_v11, 0.0  ;;  %v600_v50 = vsub.f32 1.0, %v1824_v22  ;;  %vm543_vm8 = vcmp.gt.f32.partialorder %v1808_v7, 0.0 }
 0x140   :  { %1468 = vrcp.f32 %v602_v13  ;;  %v479_v18 = vmul.f32 0.5, %v447_v14  ;;  %v448_v21 = vmin.f32 %v1820_v17, 0.0  ;;  %vm546_vm10 = vcmp.gt.f32.partialorder %v1814_v11, 0.0 }
 0x141   :  { %1470 = vtanh.f32 %v481_v15  ;;  %v482_v20 = vmul.f32 0.5, %v450_v16  ;;  %vm544_vm11 = vcmp.gt.f32.partialorder %v1820_v17, 0.0 }
 0x142   :  { %1472 = vtanh.f32 %v479_v18  ;;  %v1360_v23 = vpop.f32.mrb[12].mxu0  ;;  %v480_v25 = vmul.f32 0.5, %v448_v21  ;;  %v569_v18 = vmul.f32 2.0, %v1799_v2  ;;  %v567_v2 = vmul.f32 2.0, %v1804_v5 }
 0x143   :  { %v1826_v24 = vpop.eup %1458  ;;  %1474 = vtanh.f32 %v482_v20  ;;  %v1829_v26 = vadd.f32 %v1360_v23, %v1765_v32  ;;  %v360_v27 = vpop.f32.mrb[13].mxu0 }
 0x144   :  { %v1831_v28 = vpop.eup %1460  ;;  %v605_v29 = vsub.f32 1.0, %v1826_v24  ;;  %v1835_v30 = vadd.f32 %v1765_v32, %v360_v27  ;;  %v1361_v31 = vpop.f32.mrb[14].mxu0  ;;  %1476 = vrcp.f32 %v599_v19 }
 0x145   :  { %v1837_v33 = vpop.eup %1462  ;;  %v603_v35 = vsub.f32 1.0, %v1831_v28  ;;  %1478 = vtanh.f32 %v480_v25  ;;  %v453_v37 = vmin.f32 %v1829_v26, 0.0  ;;  %v363_v38 = vpop.f32.mrb[15].mxu0  ;;  %v1847_v46 = vadd.f32 %v1361_v31, %v1765_v32 }
 0x146   :  { %v1841_v40 = vpop.eup %1464  ;;  %1480 = vrcp.f32 %v605_v29  ;;  %v606_v41 = vsub.f32 1.0, %v1837_v33  ;;  %v451_v43 = vmin.f32 %v1835_v30, 0.0  ;;  %v1850_v48 = vadd.f32 %v1765_v32, %v363_v38 }
 0x147   :  { %1482 = vrcp.f32 %v603_v35  ;;  %v604_v44 = vsub.f32 1.0, %v1841_v40  ;;  %v485_v45 = vmul.f32 0.5, %v453_v37  ;;  %v454_v53 = vmin.f32 %v1847_v46, 0.0 }
 0x148   :  { %1484 = vrcp.f32 %v606_v41  ;;  %v483_v47 = vmul.f32 0.5, %v451_v43  ;;  %v1467_v51 = vpop.eup %1466  ;;  %v452_v56 = vmin.f32 %v1850_v48, 0.0  ;;  %vm547_vm12 = vcmp.gt.f32.partialorder %v1835_v30, 0.0 }
 0x149   :  { %1486 = vrcp.f32 %v604_v44  ;;  %v486_v60 = vmul.f32 0.5, %v454_v53  ;;  %v570_v44 = vmul.f32 2.0, %v1810_v9  ;;  %vm549_vm13 = vcmp.gt.f32.partialorder %v1829_v26, 0.0 }
 0x14a   :  { %v1469_v54 = vpop.eup %1468  ;;  %1488 = vtanh.f32 %v485_v45  ;;  %v1364_v57 = vpop.f32.mrb[16].mxu0  ;;  %v484_v10 = vmul.f32 0.5, %v452_v56  ;;  %v636_v45 = vmul.f32 %v1467_v51, %v569_v18  ;;  %vm550_vm14 = vcmp.gt.f32.partialorder %v1847_v46, 0.0 }
 0x14b   :  { %v1855_v59 = vpop.eup %1470  ;;  %1490 = vtanh.f32 %v483_v47  ;;  %v1858_v61 = vadd.f32 %v1364_v57, %v1765_v32  ;;  %v376_v62 = vpop.f32.mrb[17].mxu0  ;;  %vm548_vm15 = vcmp.gt.f32.partialorder %v1850_v48, 0.0 }
 0x14c   :  { %v1860_v63 = vpop.eup %1472  ;;  %v609_v0 = vsub.f32 1.0, %v1855_v59  ;;  %v1864_v1 = vadd.f32 %v1765_v32, %v376_v62  ;;  %v1365_v4 = vpop.f32.mrb[18].mxu0  ;;  %1492 = vrcp.f32 %v600_v50 }
 0x14d   :  { %v1866_v6 = vpop.eup %1474  ;;  %v607_v8 = vsub.f32 1.0, %v1860_v63  ;;  %1494 = vtanh.f32 %v486_v60  ;;  %v457_v12 = vmin.f32 %v1858_v61, 0.0  ;;  %v379_v13 = vpop.f32.mrb[19].mxu0  ;;  %v1879_v21 = vadd.f32 %v1365_v4, %v1765_v32 }
 0x14e   :  { %v1477_v14 = vpop.eup %1476  ;;  %1496 = vrcp.f32 %v609_v0  ;;  %v610_v15 = vsub.f32 1.0, %v1866_v6  ;;  %v455_v16 = vmin.f32 %v1864_v1, 0.0  ;;  %v1882_v23 = vadd.f32 %v1765_v32, %v379_v13 }
 0x14f   :  { %v1875_v19 = vpop.eup %1478  ;;  %1498 = vrcp.f32 %v607_v8  ;;  %v489_v20 = vmul.f32 0.5, %v457_v12  ;;  %v458_v35 = vmin.f32 %v1879_v21, 0.0  ;;  %v632_v41 = vmul.f32 %v1477_v14, %v567_v2 }
 0x150   :  { %v1884_v25 = vpop.eup %1480  ;;  %1500 = vrcp.f32 %v610_v15  ;;  %v608_v27 = vsub.f32 1.0, %v1875_v19  ;;  %v487_v29 = vmul.f32 0.5, %v455_v16  ;;  %v456_v37 = vmin.f32 %v1882_v23, 0.0 }
 0x151   :  { %v1483_v31 = vpop.eup %1482  ;;  %1502 = vtanh.f32 %v484_v10  ;;  %v490_v5 = vmul.f32 0.5, %v458_v35  ;;  %v638_v60 = vmul.f32 %v1469_v54, %v570_v44  ;;  %v568_v0 = vmul.f32 2.0, %v1824_v22 }
 0x152   :  { %v1891_v38 = vpop.eup %1484  ;;  %1504 = vrcp.f32 %v608_v27  ;;  %v1368_v43 = vpop.f32.mrb[20].mxu0  ;;  %v488_v50 = vmul.f32 0.5, %v456_v37  ;;  %v573_v10 = vmul.f32 2.0, %v1826_v24  ;;  %v571_v54 = vmul.f32 2.0, %v1831_v28 }
 0x153   :  { %v1487_v47 = vpop.eup %1486  ;;  %1506 = vtanh.f32 %v489_v20  ;;  %v1896_v53 = vadd.f32 %v1368_v43, %v1765_v32  ;;  %v392_v56 = vpop.f32.mrb[21].mxu0  ;;  %v572_v14 = vmul.f32 2.0, %v1841_v40  ;;  %v1917_v22 = vsel %vm535_vm1, %v1771_v36, %v632_v41 }
 0x154   :  { %v1898_v57 = vpop.eup %1488  ;;  %1508 = vtanh.f32 %v487_v29  ;;  %v1902_v62 = vadd.f32 %v1765_v32, %v392_v56  ;;  %v1369_v9 = vpop.f32.mrb[22].mxu0  ;;  %v1922_v24 = vsel %vm537_vm0, %v1768_v34, %v636_v45  ;;  %v1929_v28 = vsel %vm538_vm2, %v1775_v39, %v638_v60 }
 0x155   :  { %v1904_v51 = vpop.eup %1490  ;;  %1510 = vtanh.f32 %v490_v5  ;;  %v461_v4 = vmin.f32 %v1896_v53, 0.0  ;;  %v395_v8 = vpop.f32.mrb[23].mxu0  ;;  %v1932_v27 = vadd.f32 %v1369_v9, %v1765_v32  ;;  %v640_v29 = vmul.f32 %v1483_v31, %v571_v54 }
 0x156   :  { %v1493_v12 = vpop.eup %1492  ;;  %1512 = vtanh.f32 %v488_v50  ;;  %v459_v13 = vmin.f32 %v1902_v62, 0.0  ;;  %v613_v2 = vsub.f32 1.0, %v1898_v57  ;;  %v1943_v35 = vadd.f32 %v1765_v32, %v395_v8 }
 0x157   :  { %v1912_v15 = vpop.eup %1494  ;;  %v634_v16 = vmul.f32 %v1493_v12, %v568_v0  ;;  %v493_v18 = vmul.f32 0.5, %v461_v4  ;;  %v642_v37 = vmul.f32 %v1487_v47, %v572_v14  ;;  %v611_v41 = vsub.f32 1.0, %v1904_v51 }
 0x158   :  { %v1924_v20 = vpop.eup %1496  ;;  %v491_v40 = vmul.f32 0.5, %v459_v13  ;;  %v462_v43 = vmin.f32 %v1932_v27, 0.0  ;;  %v809_v5 = vpack.c.bf16 %v1929_v28, %v1922_v24  ;;  %v460_v47 = vmin.f32 %v1943_v35, 0.0 }
 0x159   :  { %v1934_v36 = vpop.eup %1498  ;;  %v1940_v34 = vsel %vm536_vm3, %v1779_v42, %v634_v16  ;;  %1514 = vtanh.f32 %v493_v18  ;;  %v614_v42 = vsub.f32 1.0, %v1912_v15  ;;  %v1962_v9 = vsel %vm539_vm4, %v1787_v52, %v640_v29 }
 0x15a   :  { %v1945_v39 = vpop.eup %1500  ;;  %v808_v31 = vpack.c.bf16 %v1940_v34, %v1917_v22  ;;  %v1372_v44 = vpop.f32.mrb[24].mxu0  ;;  %1516 = vtanh.f32 %v491_v40  ;;  %v494_v60 = vmul.f32 0.5, %v462_v43  ;;  %v1967_v0 = vsel %vm540_vm5, %v1795_v58, %v642_v37 }
 0x15b   :  { %v1951_v45 = vpop.eup %1502  ;;  %v408_v50 = vpop.f32.mrb[25].mxu0  ;;  %2313 = vst [vmem:[#allocation13_spill] sm:$0xff] %v1967_v0  ;;  %v1970_v4 = vadd.f32 %v1372_v44, %v1765_v32  ;;  %1518 = vrcp.f32 %v613_v2  ;;  %v810_v54 = vpack.c.bf16 %v1967_v0, %v1962_v9  ;;  %v574_v52 = vmul.f32 2.0, %v1837_v33 }
 0x15c   :  { %v1957_v56 = vpop.eup %1504  ;;  %1394 = vmatprep.mubr.bf16.mxu1 %v808_v31  ;;  %v1373_v8 = vpop.f32.mrb[26].mxu0  ;;  %v612_v13 = vsub.f32 1.0, %v1951_v45  ;;  %1520 = vrcp.f32 %v611_v41  ;;  %v644_v18 = vmul.f32 %v1884_v25, %v573_v10  ;;  %v492_v37 = vmul.f32 0.5, %v460_v47 }
 0x15d   :  { %v1972_v12 = vpop.eup %1506  ;;  %1395 = vmatmul.mubr.bf16.vlgmr.msra.gmra.mrb[0].mxu1 %v809_v5  ;;  %v411_v14 = vpop.f32.mrb[27].mxu0  ;;  %1522 = vtanh.f32 %v494_v60  ;;  %v646_v33 = vmul.f32 %v1891_v38, %v574_v52  ;;  %v465_v41 = vmin.f32 %v1970_v4, 0.0  ;;  %v1993_v25 = vadd.f32 %v1765_v32, %v408_v50 }
 0x15e   :  { %v1978_v16 = vpop.eup %1508  ;;  %v617_v58 = vsub.f32 1.0, %v1972_v12  ;;  %1398 = vmatprep.mubr.bf16.mxu1 %v810_v54  ;;  %1524 = vrcp.f32 %v614_v42  ;;  %v2000_v43 = vadd.f32 %v1373_v8, %v1765_v32  ;;  %v2006_v44 = vsel %vm541_vm6, %v1784_v49, %v644_v18 }
 0x15f   :  { %v1983_v40 = vpop.eup %1510  ;;  %v615_v29 = vsub.f32 1.0, %v1978_v16  ;;  %1526 = vrcp.f32 %v612_v13  ;;  %v1997_v31 = vsel %vm542_vm7, %v1791_v55, %v646_v33  ;;  %v463_v42 = vmin.f32 %v1993_v25, 0.0 }
 0x160   :  { %v1988_v2 = vpop.eup %1512  ;;  %v618_v10 = vsub.f32 1.0, %v1983_v40  ;;  %1528 = vrcp.f32 %v617_v58  ;;  %v811_v55 = vpack.c.bf16 %v1997_v31, %v2006_v44  ;;  %v466_v47 = vmin.f32 %v2000_v43, 0.0 }
 0x161   :  { %v616_v38 = vsub.f32 1.0, %v1988_v2  ;;  %1530 = vrcp.f32 %v615_v29  ;;  %v2014_v50 = vadd.f32 %v1765_v32, %v411_v14  ;;  %v497_v49 = vmul.f32 0.5, %v465_v41 }
 0x162   :  { %v1376_v5 = vpop.f32.mrb[28].mxu0  ;;  %1532 = vtanh.f32 %v492_v37  ;;  %v495_v13 = vmul.f32 0.5, %v463_v42  ;;  %v575_v54 = vmul.f32 2.0, %v1860_v63  ;;  %v498_v18 = vmul.f32 0.5, %v466_v47 }
 0x163   :  { %v424_v60 = vpop.f32.mrb[29].mxu0  ;;  %v2016_v8 = vpop.eup %1514  ;;  %1534 = vrcp.f32 %v618_v10  ;;  %v464_v29 = vmin.f32 %v2014_v50, 0.0  ;;  %v576_v37 = vmul.f32 2.0, %v1875_v19  ;;  %v2029_v0 = vadd.f32 %v1376_v5, %v1765_v32 }
 0x164   :  { %v1377_v52 = vpop.f32.mrb[30].mxu0  ;;  %v2019_v58 = vpop.eup %1516  ;;  %1536 = vrcp.f32 %v616_v38  ;;  %v648_v41 = vmul.f32 %v1934_v36, %v575_v54  ;;  %v577_v10 = vmul.f32 2.0, %v1855_v59  ;;  %v578_v47 = vmul.f32 2.0, %v1866_v6 }
 0x165   :  { %1399 = vmatmul.mubr.bf16.gmra.mrb[4].mxu1 %v811_v55  ;;  %v427_v14 = vpop.f32.mrb[31].mxu0  ;;  %v619_v33 = vsub.f32 1.0, %v2019_v58  ;;  %v2026_v42 = vpop.eup %1518  ;;  %1538 = vtanh.f32 %v495_v13  ;;  %v496_v63 = vmul.f32 0.5, %v464_v29  ;;  %v650_v38 = vmul.f32 %v1957_v56, %v576_v37 }
 0x166   :  { %v1521_v55 = vpop.eup %1520  ;;  %1540 = vtanh.f32 %v497_v49  ;;  %v621_v36 = vsub.f32 1.0, %v2016_v8  ;;  %v2041_v5 = vsel %vm543_vm8, %v1808_v7, %v648_v41  ;;  %v652_v59 = vmul.f32 %v1924_v20, %v577_v10 }
 0x167   :  { %v2035_v19 = vpop.eup %1522  ;;  %1542 = vtanh.f32 %v498_v18  ;;  %2314 = vst [vmem:[#allocation14_spill] sm:$0xff] %v2041_v5  ;;  %v2046_v56 = vsel %vm544_vm11, %v1820_v17, %v650_v38  ;;  %v469_v6 = vmin.f32 %v2029_v0, 0.0  ;;  %v654_v49 = vmul.f32 %v1945_v39, %v578_v47 }
 0x168   :  { %v1525_v13 = vpop.eup %1524  ;;  %1544 = vtanh.f32 %v496_v63  ;;  %2315 = vst [vmem:[#allocation15_spill] sm:$0xff] %v2046_v56  ;;  %v622_v7 = vsub.f32 1.0, %v2035_v19  ;;  %v812_v20 = vpack.c.bf16 %v2046_v56, %v2041_v5  ;;  %v2055_v18 = vadd.f32 %v1765_v32, %v424_v60 }
 0x169   :  { %v1527_v54 = vpop.eup %1526  ;;  %1546 = vrcp.f32 %v619_v33  ;;  %v2062_v17 = vsel %vm545_vm9, %v1802_v3, %v652_v59  ;;  %v2067_v39 = vsel %vm546_vm10, %v1814_v11, %v654_v49  ;;  %v2070_v33 = vadd.f32 %v1377_v52, %v1765_v32 }
 0x16a   :  { %v2057_v29 = vpop.eup %1528  ;;  %2316 = vst [vmem:[#allocation16_spill] sm:$0xff] %v2062_v17  ;;  %2317 = vst [vmem:[#allocation17_spill] sm:$0xff] %v2067_v39  ;;  %v2073_v37 = vadd.f32 %v1765_v32, %v427_v14  ;;  %1402 = vmatprep.mubr.bf16.mxu1 %v812_v20  ;;  %v813_v3 = vpack.c.bf16 %v2067_v39, %v2062_v17  ;;  %v467_v41 = vmin.f32 %v2055_v18, 0.0  ;;  %1548 = vrcp.f32 %v621_v36 }
 0x16b   :  { %v1531_v60 = vpop.eup %1530  ;;  %v501_v11 = vmul.f32 0.5, %v469_v6  ;;  %v470_v52 = vmin.f32 %v2070_v33, 0.0  ;;  %v579_v47 = vmul.f32 2.0, %v1904_v51  ;;  %v580_v59 = vmul.f32 2.0, %v1951_v45 }
 0x16c   :  { %v2080_v63 = vpop.eup %1532  ;;  %v468_v32 = vmin.f32 %v2073_v37, 0.0  ;;  %v499_v38 = vmul.f32 0.5, %v467_v41  ;;  %vm551_vm0 = vcmp.gt.f32.partialorder %v1864_v1, 0.0  ;;  %1550 = vrcp.f32 %v622_v7 }
 0x16d   :  { %v1535_v14 = vpop.eup %1534  ;;  %v620_v10 = vsub.f32 1.0, %v2080_v63  ;;  %1403 = vmatmul.mubr.bf16.gmra.mrb[8].mxu1 %v813_v3  ;;  %v502_v20 = vmul.f32 0.5, %v470_v52  ;;  %v581_v36 = vmul.f32 2.0, %v1898_v57  ;;  %v656_v56 = vmul.f32 %v1521_v55, %v579_v47 }
 0x16e   :  { %v1537_v49 = vpop.eup %1536  ;;  %v658_v39 = vmul.f32 %v1527_v54, %v580_v59  ;;  %v582_v5 = vmul.f32 2.0, %v1912_v15  ;;  %v500_v45 = vmul.f32 0.5, %v468_v32  ;;  %v585_v52 = vmul.f32 2.0, %v1972_v12 }
 0x16f   :  { %v2089_v6 = vpop.eup %1538  ;;  %1552 = vrcp.f32 %v620_v10  ;;  %v660_v41 = vmul.f32 %v2026_v42, %v581_v36  ;;  %v2101_v57 = vsel %vm547_vm12, %v1835_v30, %v656_v56  ;;  %v586_v32 = vmul.f32 2.0, %v1983_v40 }
 0x170   :  { %v2092_v3 = vpop.eup %1540  ;;  %v623_v51 = vsub.f32 1.0, %v2089_v6  ;;  %1554 = vtanh.f32 %v501_v11  ;;  %v2106_v15 = vsel %vm548_vm15, %v1850_v48, %v658_v39  ;;  %v662_v55 = vmul.f32 %v1525_v13, %v582_v5 }
 0x171   :  { %v2096_v17 = vpop.eup %1542  ;;  %1556 = vtanh.f32 %v499_v38  ;;  %v814_v7 = vpack.c.bf16 %v2106_v15, %v2101_v57  ;;  %v2113_v42 = vsel %vm549_vm13, %v1829_v26, %v660_v41  ;;  %v583_v11 = vmul.f32 2.0, %v1978_v16 }
 0x172   :  { %v1545_v54 = vpop.eup %1544  ;;  %1558 = vrcp.f32 %v623_v51  ;;  %v2119_v48 = vsel %vm550_vm14, %v1847_v46, %v662_v55  ;;  %v584_v5 = vmul.f32 2.0, %v1988_v2  ;;  %v626_v13 = vsub.f32 1.0, %v2096_v17 }
 0x173   :  { %v1547_v30 = vpop.eup %1546  ;;  %v624_v56 = vsub.f32 1.0, %v1545_v54  ;;  %1560 = vtanh.f32 %v502_v20  ;;  %1406 = vmatprep.mubr.bf16.mxu1 %v814_v7  ;;  %v815_v39 = vpack.c.bf16 %v2119_v48, %v2113_v42  ;;  %v664_v26 = vmul.f32 %v1531_v60, %v583_v11 }
 0x174   :  { %v666_v16 = vmul.f32 %v1537_v49, %v584_v5  ;;  %v587_v10 = vmul.f32 2.0, %v2019_v58  ;;  %v1549_v38 = vpop.eup %1548  ;;  %vm552_vm1 = vcmp.gt.f32.partialorder %v1882_v23, 0.0  ;;  %v625_v46 = vsub.f32 1.0, %v2092_v3 }
 0x175   :  { %1562 = vrcp.f32 %v624_v56  ;;  %1407 = vmatmul.mubr.bf16.gmra.mrb[12].mxu1 %v815_v39  ;;  %v2133_v2 = vsel %vm551_vm0, %v1864_v1, %v664_v26  ;;  %v668_v60 = vmul.f32 %v2057_v29, %v585_v52  ;;  %v670_v40 = vmul.f32 %v1535_v14, %v586_v32 }
 0x176   :  { %1564 = vtanh.f32 %v500_v45  ;;  %v2136_v12 = vsel %vm552_vm1, %v1882_v23, %v666_v16  ;;  %v672_v47 = vmul.f32 %v1547_v30, %v587_v10  ;;  %v1551_v58 = vpop.eup %1550  ;;  %vm554_vm2 = vcmp.gt.f32.partialorder %v1879_v21, 0.0 }
 0x177   :  { %1566 = vrcp.f32 %v626_v13  ;;  %v816_v59 = vpack.c.bf16 %v2136_v12, %v2133_v2  ;;  %v588_v49 = vmul.f32 2.0, %v2080_v63  ;;  %v2144_v1 = vsel %vm554_vm2, %v1879_v21, %v670_v40 }
 0x178   :  { %vm553_vm3 = vcmp.gt.f32.partialorder %v1858_v61, 0.0  ;;  %vm555_vm4 = vcmp.gt.f32.partialorder %v1902_v62, 0.0  ;;  %1568 = vrcp.f32 %v625_v46  ;;  %vm556_vm5 = vcmp.gt.f32.partialorder %v1943_v35, 0.0 }
 0x179   :  { %v1553_v20 = vpop.eup %1552  ;;  %1410 = vmatprep.mubr.bf16.mxu1 %v816_v59  ;;  %v2152_v14 = vsel %vm553_vm3, %v1858_v61, %v668_v60  ;;  %v2155_v63 = vsel %vm555_vm4, %v1902_v62, %v672_v47  ;;  %v590_v21 = vmul.f32 2.0, %v2035_v19  ;;  %v591_v7 = vmul.f32 2.0, %v2089_v6 }
 0x17a   :  { %v2146_v36 = vpop.eup %1554  ;;  %v674_v23 = vmul.f32 %v1553_v20, %v588_v49  ;;  %v817_v41 = vpack.c.bf16 %v2144_v1, %v2152_v14  ;;  %v589_v30 = vmul.f32 2.0, %v2016_v8  ;;  %v592_v5 = vmul.f32 2.0, %v1545_v54 }
 0x17b   :  { %v1557_v29 = vpop.eup %1556  ;;  %v678_v62 = vmul.f32 %v1551_v58, %v590_v21  ;;  %v629_v56 = vsub.f32 1.0, %v2146_v36  ;;  %vm558_vm6 = vcmp.gt.f32.partialorder %v1932_v27, 0.0  ;;  %vm559_vm7 = vcmp.gt.f32.partialorder %v1993_v25, 0.0 }
 0x17c   :  { %v1559_v51 = vpop.eup %1558  ;;  %v627_v45 = vsub.f32 1.0, %v1557_v29  ;;  %v2161_v55 = vsel %vm556_vm5, %v1943_v35, %v674_v23  ;;  %v676_v35 = vmul.f32 %v1549_v38, %v589_v30  ;;  %vm560_vm8 = vcmp.gt.f32.partialorder %v2014_v50, 0.0 }
 0x17d   :  { %v1561_v11 = vpop.eup %1560  ;;  %v818_v61 = vpack.c.bf16 %v2161_v55, %v2155_v63  ;;  %1411 = vmatmul.mubr.bf16.gmra.mrb[16].mxu1 %v817_v41  ;;  %v680_v13 = vmul.f32 %v1559_v51, %v591_v7  ;;  %v2172_v52 = vsel %vm558_vm6, %v1932_v27, %v678_v62  ;;  %vm557_vm9 = vcmp.gt.f32.partialorder %v1896_v53, 0.0 }
 0x17e   :  { %v630_v19 = vsub.f32 1.0, %v1561_v11  ;;  %1570 = vrcp.f32 %v627_v45  ;;  %v2182_v10 = vsel %vm557_vm9, %v1896_v53, %v676_v35  ;;  %v594_v27 = vmul.f32 2.0, %v2096_v17 }
 0x17f   :  { %v1563_v39 = vpop.eup %1562  ;;  %1414 = vmatprep.mubr.bf16.mxu1 %v818_v61  ;;  %v2176_v54 = vsel %vm559_vm7, %v1993_v25, %v680_v13  ;;  %v819_v60 = vpack.c.bf16 %v2172_v52, %v2182_v10  ;;  %v593_v40 = vmul.f32 2.0, %v2092_v3  ;;  %vm562_vm10 = vcmp.gt.f32.partialorder %v2000_v43, 0.0 }
 0x180   :  { %v1565_v26 = vpop.eup %1564  ;;  %1572 = vrcp.f32 %v630_v19  ;;  %v682_v6 = vmul.f32 %v1563_v39, %v592_v5  ;;  %vm561_vm11 = vcmp.gt.f32.partialorder %v1970_v4, 0.0  ;;  %v595_v17 = vmul.f32 2.0, %v1557_v29 }
 0x181   :  { %v628_v8 = vsub.f32 1.0, %v1565_v26  ;;  %v1567_v16 = vpop.eup %1566  ;;  %1574 = vrcp.f32 %v629_v56  ;;  %v598_v49 = vmul.f32 2.0, %v1561_v11  ;;  %v596_v23 = vmul.f32 2.0, %v1565_v26 }
 0x182   :  { %v2179_v32 = vsel %vm560_vm8, %v2014_v50, %v682_v6  ;;  %v1569_v46 = vpop.eup %1568  ;;  %v686_v25 = vmul.f32 %v1567_v16, %v594_v27  ;;  %v597_v45 = vmul.f32 2.0, %v2146_v36  ;;  %vm563_vm12 = vcmp.gt.f32.partialorder %v2055_v18, 0.0 }
 0x183   :  { %1576 = vrcp.f32 %v628_v8  ;;  %v820_v38 = vpack.c.bf16 %v2179_v32, %v2176_v54  ;;  %v684_v50 = vmul.f32 %v1569_v46, %v593_v40  ;;  %vm564_vm13 = vcmp.gt.f32.partialorder %v2073_v37, 0.0 }
 0x184   :  { %v2192_v53 = vsel %vm562_vm10, %v2000_v43, %v686_v25  ;;  %vm566_vm14 = vcmp.gt.f32.partialorder %v2070_v33, 0.0  ;;  %vm565_vm15 = vcmp.gt.f32.partialorder %v2029_v0, 0.0  ;;  %v2318_v25 = vld [vmem:[#allocation13_spill] sm:$0xff] }
 0x185   :  { %1415 = vmatmul.mubr.bf16.gmra.mrb[20].mxu1 %v819_v60  ;;  %v2196_v59 = vsel %vm561_vm11, %v1970_v4, %v684_v50 }
 0x186   :  { %1418 = vmatprep.mubr.bf16.mxu1 %v820_v38  ;;  %v821_v3 = vpack.c.bf16 %v2192_v53, %v2196_v59 }
 0x188   :  { %v1571_v47 = vpop.eup %1570 }
 0x189   :  { %v688_v21 = vmul.f32 %v1571_v47, %v595_v17 }
 0x18a   :  { %v1573_v58 = vpop.eup %1572 }
 0x18b   :  { %v1575_v20 = vpop.eup %1574  ;;  %v694_v41 = vmul.f32 %v1573_v58, %v598_v49  ;;  %v2205_v4 = vsel %vm563_vm12, %v2055_v18, %v688_v21  ;;  %v2224_v18 = vld [vmem:[%s2306_s4] ss:$0 sm:$0xff]  ;;  %v2320_v21 = vld [vmem:[#allocation14_spill] sm:$0xff]  ;;  %s1677_s4 = smov [#allocation9]  }
 0x18c   :  { %v692_v29 = vmul.f32 %v1575_v20, %v597_v45  ;;  %v2319_v20 = vld [vmem:[#allocation16_spill] sm:$0xff]  ;;  %v2321_v45 = vld [vmem:[#allocation17_spill] sm:$0xff]  ;;  %s1172_s6 = sshll.u32 %s1677_s4, 4  ;;  %s1173_s6 = int_to_ptr.vmem [resolvable:$true] %s1172_s6 }
 0x18d   :  { %v1577_v51 = vpop.eup %1576  ;;  %1419 = vmatmul.mubr.bf16.gmra.mrb[24].mxu1 %v821_v3  ;;  %v2213_v36 = vsel %vm566_vm14, %v2070_v33, %v694_v41  ;;  %s1644_s7 = scalar_lea.vmem %s1173_s6, 4096  ;;  %p1649_p11 = scmp.lt.s32.totalorder %s1173_s6, %s1173_s6 }
 0x18e   :  { %v690_v43 = vmul.f32 %v1577_v51, %v596_v23  ;;  %v2217_v61 = vsel %vm565_vm15, %v2029_v0, %v692_v29  ;;  %p1645_p10 = scmp.ne.s32.totalorder %s1173_s6, %s1644_s7  ;;  %p1650_p12 = scmp.lt.s32.totalorder %s1644_s7, %s1644_s7 }
 0x18f   :  { %v823_v30 = vpack.c.bf16 %v2213_v36, %v2217_v61 }
 0x190   :  { %v2208_v7 = vsel %vm564_vm13, %v2073_v37, %v690_v43  ;;  %v2322_v43 = vld [vmem:[#allocation15_spill] sm:$0xff]  ;;  %p1651_p13 = por %p1650_p12, %p1649_p11 }
 0x191   :  { %v822_v11 = vpack.c.bf16 %v2208_v7, %v2205_v4 }
 0x192   :  { %p1652_p0 = pnand %p1651_p13, %p1645_p10 }
 0x193   :  { %1422 = vmatprep.mubr.bf16.mxu1 %v822_v11 }
 0x195   :  { %1423 = vmatmul.mubr.bf16.gmra.mrb[28].mxu1 %v823_v30 }
 0x230   :  { %v1396_v37 = vpop.f32.mrb[0].mxu1 }
 0x231   :  { %v921_v62 = vadd.f32 %v1396_v37, %v2224_v18  ;;  %v912_v33 = vpop.f32.mrb[1].mxu1 }
 0x232   :  { %v913_v56 = vadd.f32 %v2224_v18, %v912_v33  ;;  %v1397_v19 = vpop.f32.mrb[2].mxu1 }
 0x233   :  { %v1041_v5 = vadd.f32 %v921_v62, %v1922_v24  ;;  %v924_v0 = vadd.f32 %v1397_v19, %v2224_v18  ;;  %v915_v13 = vpop.f32.mrb[3].mxu1 }
 0x234   :  { %v1039_v39 = vadd.f32 %v913_v56, %v1917_v22  ;;  %v916_v35 = vadd.f32 %v2224_v18, %v915_v13 }
 0x235   :  { %1137 = vst [vmem:[#allocation9 + $0x10] sm:$0xff] %v1041_v5  ;;  %v1042_v26 = vadd.f32 %v924_v0, %v1929_v28 }
 0x236   :  { %1135 = vst [vmem:[#allocation9] sm:$0xff] %v1039_v39  ;;  %v1040_v6 = vadd.f32 %v916_v35, %v1940_v34 }
 0x237   :  { %1138 = vst [vmem:[#allocation9 + $0x18] sm:$0xff] %v1042_v26 }
 0x238   :  { %1136 = vst [vmem:[#allocation9 + $0x8] sm:$0xff] %v1040_v6  ;;  %v1400_v8 = vpop.f32.mrb[4].mxu1 }
 0x239   :  { %v937_v16 = vadd.f32 %v1400_v8, %v2224_v18  ;;  %v928_v38 = vpop.f32.mrb[5].mxu1 }
 0x23a   :  { %v929_v24 = vadd.f32 %v2224_v18, %v928_v38  ;;  %v1401_v27 = vpop.f32.mrb[6].mxu1 }
 0x23b   :  { %v1045_v46 = vadd.f32 %v937_v16, %v2006_v44  ;;  %v940_v22 = vadd.f32 %v1401_v27, %v2224_v18  ;;  %v931_v60 = vpop.f32.mrb[7].mxu1 }
 0x23c   :  { %v1043_v40 = vadd.f32 %v929_v24, %v1962_v9  ;;  %v932_v28 = vadd.f32 %v2224_v18, %v931_v60 }
 0x23d   :  { %1141 = vst [vmem:[#allocation9 + $0x30] sm:$0xff] %v1045_v46  ;;  %v1046_v34 = vadd.f32 %v940_v22, %v1997_v31 }
 0x23e   :  { %1139 = vst [vmem:[#allocation9 + $0x20] sm:$0xff] %v1043_v40  ;;  %v1044_v50 = vadd.f32 %v932_v28, %v2318_v25 }
 0x23f   :  { %1142 = vst [vmem:[#allocation9 + $0x38] sm:$0xff] %v1046_v34 }
 0x240   :  { %1140 = vst [vmem:[#allocation9 + $0x28] sm:$0xff] %v1044_v50  ;;  %v1404_v47 = vpop.f32.mrb[8].mxu1 }
 0x241   :  { %v953_v58 = vadd.f32 %v1404_v47, %v2224_v18  ;;  %v944_v17 = vpop.f32.mrb[9].mxu1 }
 0x242   :  { %v945_v44 = vadd.f32 %v2224_v18, %v944_v17  ;;  %v1405_v49 = vpop.f32.mrb[10].mxu1 }
 0x243   :  { %v1049_v3 = vadd.f32 %v953_v58, %v2319_v20  ;;  %v956_v9 = vadd.f32 %v1405_v49, %v2224_v18  ;;  %v947_v23 = vpop.f32.mrb[11].mxu1 }
 0x244   :  { %v1047_v51 = vadd.f32 %v945_v44, %v2320_v21  ;;  %v948_v31 = vadd.f32 %v2224_v18, %v947_v23 }
 0x245   :  { %1145 = vst [vmem:[#allocation9 + $0x50] sm:$0xff] %v1049_v3  ;;  %v1050_v41 = vadd.f32 %v956_v9, %v2321_v45 }
 0x246   :  { %1143 = vst [vmem:[#allocation9 + $0x40] sm:$0xff] %v1047_v51  ;;  %v1048_v29 = vadd.f32 %v948_v31, %v2322_v43 }
 0x247   :  { %1146 = vst [vmem:[#allocation9 + $0x58] sm:$0xff] %v1050_v41 }
 0x248   :  { %1144 = vst [vmem:[#allocation9 + $0x48] sm:$0xff] %v1048_v29  ;;  %v1408_v11 = vpop.f32.mrb[12].mxu1 }
 0x249   :  { %v969_v30 = vadd.f32 %v1408_v11, %v2224_v18  ;;  %v960_v37 = vpop.f32.mrb[13].mxu1 }
 0x24a   :  { %v961_v62 = vadd.f32 %v2224_v18, %v960_v37  ;;  %v1409_v33 = vpop.f32.mrb[14].mxu1 }
 0x24b   :  { %v1053_v56 = vadd.f32 %v969_v30, %v2113_v42  ;;  %v972_v19 = vadd.f32 %v1409_v33, %v2224_v18  ;;  %v963_v5 = vpop.f32.mrb[15].mxu1 }
 0x24c   :  { %v1051_v0 = vadd.f32 %v961_v62, %v2101_v57  ;;  %v964_v13 = vadd.f32 %v2224_v18, %v963_v5 }
 0x24d   :  { %1149 = vst [vmem:[#allocation9 + $0x70] sm:$0xff] %v1053_v56  ;;  %v1054_v39 = vadd.f32 %v972_v19, %v2119_v48 }
 0x24e   :  { %1147 = vst [vmem:[#allocation9 + $0x60] sm:$0xff] %v1051_v0  ;;  %v1052_v35 = vadd.f32 %v964_v13, %v2106_v15 }
 0x24f   :  { %1150 = vst [vmem:[#allocation9 + $0x78] sm:$0xff] %v1054_v39 }
 0x250   :  { %1148 = vst [vmem:[#allocation9 + $0x68] sm:$0xff] %v1052_v35  ;;  %v1412_v26 = vpop.f32.mrb[16].mxu1 }
 0x251   :  { %v985_v6 = vadd.f32 %v1412_v26, %v2224_v18  ;;  %v976_v8 = vpop.f32.mrb[17].mxu1 }
 0x252   :  { %v977_v42 = vadd.f32 %v2224_v18, %v976_v8  ;;  %v1413_v16 = vpop.f32.mrb[18].mxu1 }
 0x253   :  { %v1057_v38 = vadd.f32 %v985_v6, %v2152_v14  ;;  %v988_v57 = vadd.f32 %v1413_v16, %v2224_v18  ;;  %v979_v24 = vpop.f32.mrb[19].mxu1 }
 0x254   :  { %v1055_v27 = vadd.f32 %v977_v42, %v2133_v2  ;;  %v980_v48 = vadd.f32 %v2224_v18, %v979_v24 }
 0x255   :  { %1153 = vst [vmem:[#allocation9 + $0x90] sm:$0xff] %v1057_v38  ;;  %v1058_v15 = vadd.f32 %v988_v57, %v2144_v1 }
 0x256   :  { %1151 = vst [vmem:[#allocation9 + $0x80] sm:$0xff] %v1055_v27  ;;  %v1056_v46 = vadd.f32 %v980_v48, %v2136_v12 }
 0x257   :  { %1154 = vst [vmem:[#allocation9 + $0x98] sm:$0xff] %v1058_v15 }
 0x258   :  { %1152 = vst [vmem:[#allocation9 + $0x88] sm:$0xff] %v1056_v46  ;;  %v1416_v22 = vpop.f32.mrb[20].mxu1 }
 0x259   :  { %v1001_v60 = vadd.f32 %v1416_v22, %v2224_v18  ;;  %v992_v40 = vpop.f32.mrb[21].mxu1 }
 0x25a   :  { %v993_v14 = vadd.f32 %v2224_v18, %v992_v40  ;;  %v1417_v28 = vpop.f32.mrb[22].mxu1 }
 0x25b   :  { %v1061_v34 = vadd.f32 %v1001_v60, %v2182_v10  ;;  %v1004_v2 = vadd.f32 %v1417_v28, %v2224_v18  ;;  %v995_v25 = vpop.f32.mrb[23].mxu1 }
 0x25c   :  { %v1059_v50 = vadd.f32 %v993_v14, %v2155_v63  ;;  %v996_v1 = vadd.f32 %v2224_v18, %v995_v25 }
 0x25d   :  { %1157 = vst [vmem:[#allocation9 + $0xb0] sm:$0xff] %v1061_v34  ;;  %v1062_v12 = vadd.f32 %v1004_v2, %v2172_v52 }
 0x25e   :  { %1155 = vst [vmem:[#allocation9 + $0xa0] sm:$0xff] %v1059_v50  ;;  %v1060_v47 = vadd.f32 %v996_v1, %v2161_v55 }
 0x25f   :  { %1158 = vst [vmem:[#allocation9 + $0xb8] sm:$0xff] %v1062_v12 }
 0x260   :  { %1156 = vst [vmem:[#allocation9 + $0xa8] sm:$0xff] %v1060_v47  ;;  %v1420_v58 = vpop.f32.mrb[24].mxu1 }
 0x261   :  { %v1017_v17 = vadd.f32 %v1420_v58, %v2224_v18  ;;  %v1008_v44 = vpop.f32.mrb[25].mxu1 }
 0x262   :  { %v1009_v10 = vadd.f32 %v2224_v18, %v1008_v44  ;;  %v1421_v49 = vpop.f32.mrb[26].mxu1 }
 0x263   :  { %v1065_v20 = vadd.f32 %v1017_v17, %v2196_v59  ;;  %v1020_v63 = vadd.f32 %v1421_v49, %v2224_v18  ;;  %v1011_v3 = vpop.f32.mrb[27].mxu1 }
 0x264   :  { %v1063_v9 = vadd.f32 %v1009_v10, %v2176_v54  ;;  %v1012_v52 = vadd.f32 %v2224_v18, %v1011_v3 }
 0x265   :  { %1161 = vst [vmem:[#allocation9 + $0xd0] sm:$0xff] %v1065_v20  ;;  %v1066_v55 = vadd.f32 %v1020_v63, %v2192_v53 }
 0x266   :  { %1159 = vst [vmem:[#allocation9 + $0xc0] sm:$0xff] %v1063_v9  ;;  %v1064_v23 = vadd.f32 %v1012_v52, %v2179_v32 }
 0x267   :  { %1162 = vst [vmem:[#allocation9 + $0xd8] sm:$0xff] %v1066_v55 }
 0x268   :  { %1160 = vst [vmem:[#allocation9 + $0xc8] sm:$0xff] %v1064_v23  ;;  %v1424_v21 = vpop.f32.mrb[28].mxu1 }
 0x269   :  { %v1033_v51 = vadd.f32 %v1424_v21, %v2224_v18  ;;  %v1024_v31 = vpop.f32.mrb[29].mxu1 }
 0x26a   :  { %v1025_v59 = vadd.f32 %v2224_v18, %v1024_v31  ;;  %v1425_v45 = vpop.f32.mrb[30].mxu1 }
 0x26b   :  { %v1069_v41 = vadd.f32 %v1033_v51, %v2217_v61  ;;  %v1036_v54 = vadd.f32 %v1425_v45, %v2224_v18  ;;  %v1027_v43 = vpop.f32.mrb[31].mxu1 }
 0x26c   :  { %v1067_v53 = vadd.f32 %v1025_v59, %v2205_v4  ;;  %v1028_v32 = vadd.f32 %v2224_v18, %v1027_v43 }
 0x26d   :  { %1165 = vst [vmem:[#allocation9 + $0xf0] sm:$0xff] %v1069_v41  ;;  %v1070_v29 = vadd.f32 %v1036_v54, %v2213_v36 }
 0x26e   :  { %1163 = vst [vmem:[#allocation9 + $0xe0] sm:$0xff] %v1067_v53  ;;  %v1068_v11 = vadd.f32 %v1028_v32, %v2208_v7 }
 0x26f   :  { %1166 = vst [vmem:[#allocation9 + $0xf8] sm:$0xff] %v1070_v29 }
 0x270   :  { %1164 = vst [vmem:[#allocation9 + $0xe8] sm:$0xff] %v1068_v11 }
 0x271   :  { %1655 = shalt.err (!%p1652_p0)
}
 0x272   :  { %s1656_s10 = scalar_lea.hbm %s2307_s5, 4096 }
 0x273   :  { %p1657_p1 = scmp.ne.s32.totalorder %s2307_s5, %s1656_s10  ;;  %p1660_p2 = scmp.lt.u32.totalorder %s1656_s10, %s2307_s5 }
 0x275   :  { %p1662_p3 = pnand %p1660_p2, %p1657_p1 }
 0x277   :  { %1665 = shalt.err (!%p1662_p3)
}
 0x278   :  { %s1678_s15 = smov 128   ;;  %s1679_s16 = smov 8  }
 0x279   :  { %1178 = dma.vmem_to_hbm [thread:$0]  %s1173_s6, 4096, %s2307_s5, [#allocation5], %s1678_s15, %s1678_s15, %s1679_s16  }
 0x27a   :  { %1670 = dma.done.wait [#allocation5], 4096  }
 0x27b   :  { %1671 = vsyncadd [#allocation5], 4294963200 }
 0x27c   :  { %1182 = vsyncpa [#allocation4], 1 }
 0x27d   :  { %1183 = vsyncpa [#allocation7], 1 }
 0x27e   :  { %1184 = vsyncpa [#allocation5], 1 }

</bundles_post_ra>
